<compile_context>
chip_gen: v5e
topology: v5e:2x2
jax: 0.10.0
libtpu: 0.0.40
codegen_flags: <defaults>
</compile_context>

<pallas_src>
import math

import jax
import jax.numpy as jnp
from jax import lax
from jax.experimental import pallas as pl
from jax.experimental.pallas import tpu as pltpu


def _lstm_kernel(gx_ref, u_ref, wf_ref, bf_ref,
                 pred_ref, h_out_ref, c_out_ref,
                 h_scr, c_scr):
    """One (batch_chunk, time_chunk) grid step of the LSTM recurrence.

    gx_ref : (T_c, B_c, 4*HS)  precomputed x-side gates (+bias), time-major
    u_ref  : (HS, 4*HS)        recurrent weights
    h_scr/c_scr : (B_c, HS)    carried state across the time-chunk grid axis
    """
    tchunk = pl.program_id(1)
    n_tchunks = pl.num_programs(1)
    B_c, HS = h_scr.shape
    T_c = gx_ref.shape[0]

    # ---- init carried state at the first time chunk of each batch chunk -----
    @pl.when(tchunk == 0)
    def _():
        h_scr[...] = jnp.zeros_like(h_scr)
        c_scr[...] = jnp.zeros_like(c_scr)

    # Recurrent weights loaded once per grid step (32x128 f32 = 4 vregs),
    # resident across the whole in-chunk recurrence.
    u_mat = u_ref[...]

    # ---- serial recurrence: only h @ U + gate math on the critical path -----
    def step(t, carry):
        h, c = carry
        gates = gx_ref[t] + jnp.dot(h, u_mat, preferred_element_type=jnp.float32)
        # Full-width transcendentals: one sigmoid pass + one tanh pass over the
        # whole (B_c, 4*HS) gates vreg, then slice the activated gates.
        sg = jax.nn.sigmoid(gates)
        th = jnp.tanh(gates)
        i_t = sg[:, 0 * HS:1 * HS]
        f_t = sg[:, 1 * HS:2 * HS]
        g_t = th[:, 2 * HS:3 * HS]
        o_t = sg[:, 3 * HS:4 * HS]
        c_new = f_t * c + i_t * g_t
        h_new = o_t * jnp.tanh(c_new)
        return h_new, c_new

    h_t, c_t = lax.fori_loop(0, T_c, step, (h_scr[...], c_scr[...]), unroll=True)
    h_scr[...] = h_t
    c_scr[...] = c_t

    # ---- finalize: write outputs after the last time chunk ------------------
    @pl.when(tchunk == n_tchunks - 1)
    def _():
        h_out_ref[...] = h_t.astype(h_out_ref.dtype)
        c_out_ref[...] = c_t.astype(c_out_ref.dtype)
        pred_ref[...] = (jnp.dot(h_t, wf_ref[...],
                                 preferred_element_type=jnp.float32)
                         + bf_ref[...]).astype(pred_ref.dtype)


def _pick_chunk(total, target):
    """Largest divisor of `total` that is <= target."""
    c = min(total, target)
    while total % c != 0:
        c -= 1
    return c


def custom_lstm_forward(x, params, *, time_chunk_target=32):
    """x: (batch, seq, input_sz) float32.  Returns (prediction, (h_t, c_t))."""
    bs, seq, input_sz = x.shape
    HS = params["W"].shape[0]

    # --- x-side work in XLA (fused batched matmuls over all timesteps) -------
    x_proj = x @ params["Wp"].T + params["bp"]                 # (bs, seq, HS)
    gates_x = x_proj @ params["W"] + params["bias"]            # (bs, seq, 4*HS)
    gates_x_tm = jnp.transpose(gates_x, (1, 0, 2))             # (seq, bs, 4*HS)

    # --- chunking: bound unroll / VMEM, enable 2-TC batch split on v7x --------
    t_chunk = _pick_chunk(seq, time_chunk_target)
    if bs >= 16 and bs % 2 == 0 and (bs // 2) % 8 == 0:
        b_chunk = bs // 2          # one half per TensorCore (v7x megacore)
    else:
        b_chunk = bs               # keep sublanes full at small batch
    grid = (bs // b_chunk, seq // t_chunk)

    u = params["U"]                                            # (HS, 4*HS)
    wf_t = params["Wf"].T                                      # (HS, input_sz)
    bf = params["bf"].reshape(1, input_sz)

    grid_spec = pltpu.PrefetchScalarGridSpec(
        num_scalar_prefetch=0,
        grid=grid,
        in_specs=[
            # gates_x streamed per (time-chunk, batch-chunk); auto double-buffered.
            pl.BlockSpec((t_chunk, b_chunk, 4 * HS), lambda b, t: (t, b, 0)),
            pl.BlockSpec((HS, 4 * HS), lambda b, t: (0, 0)),       # U
            pl.BlockSpec((HS, input_sz), lambda b, t: (0, 0)),     # Wf^T
            pl.BlockSpec((1, input_sz), lambda b, t: (0, 0)),      # bf
        ],
        out_specs=[
            pl.BlockSpec((b_chunk, input_sz), lambda b, t: (b, 0)),  # prediction
            pl.BlockSpec((b_chunk, HS), lambda b, t: (b, 0)),        # h_t
            pl.BlockSpec((b_chunk, HS), lambda b, t: (b, 0)),        # c_t
        ],
        scratch_shapes=[
            pltpu.VMEM((b_chunk, HS), jnp.float32),                  # h carry
            pltpu.VMEM((b_chunk, HS), jnp.float32),                  # c carry
        ],
    )

    pred, h_t, c_t = pl.pallas_call(
        _lstm_kernel,
        grid_spec=grid_spec,
        out_shape=(
            jax.ShapeDtypeStruct((bs, input_sz), jnp.float32),
            jax.ShapeDtypeStruct((bs, HS), jnp.float32),
            jax.ShapeDtypeStruct((bs, HS), jnp.float32),
        ),
        compiler_params=pltpu.CompilerParams(
            # batch chunks are independent; time recurrence is serial.
            dimension_semantics=("parallel", "arbitrary"),
            vmem_limit_bytes=32 * 1024 * 1024,
        ),
    )(gates_x_tm, u, wf_t, bf)

    return pred, (h_t, c_t)


def init_params(key, input_sz, hidden_sz):
    """Deterministic init mirroring CustomLSTM.init_weights (uniform(-stdv, stdv))."""
    stdv = 1.0 / math.sqrt(hidden_sz)
    ks = jax.random.split(key, 7)
    u = lambda k, shape: jax.random.uniform(k, shape, jnp.float32, -stdv, stdv)
    return {
        "Wp": u(ks[0], (hidden_sz, input_sz)),     # nn.Linear(input_sz, hidden_sz).weight
        "bp": u(ks[1], (hidden_sz,)),              # .bias
        "W": u(ks[2], (hidden_sz, hidden_sz * 4)),
        "U": u(ks[3], (hidden_sz, hidden_sz * 4)),
        "bias": u(ks[4], (hidden_sz * 4,)),
        "Wf": u(ks[5], (input_sz, hidden_sz)),     # nn.Linear(hidden_sz, input_sz).weight
        "bf": u(ks[6], (input_sz,)),               # .bias
    }


def reference_forward(x, params):
    """Pure-JAX reference replicating the PyTorch forward exactly."""
    bs, seq, _ = x.shape
    HS = params["W"].shape[0]
    x_proj = x @ params["Wp"].T + params["bp"]
    h_t = jnp.zeros((bs, HS), jnp.float32)
    c_t = jnp.zeros((bs, HS), jnp.float32)
    for t in range(seq):
        gates = x_proj[:, t, :] @ params["W"] + h_t @ params["U"] + params["bias"]
        i_t = jax.nn.sigmoid(gates[:, :HS])
        f_t = jax.nn.sigmoid(gates[:, HS:2 * HS])
        g_t = jnp.tanh(gates[:, 2 * HS:3 * HS])
        o_t = jax.nn.sigmoid(gates[:, 3 * HS:])
        c_t = f_t * c_t + i_t * g_t
        h_t = o_t * jnp.tanh(c_t)
    pred = h_t @ params["Wf"].T + params["bf"]
    return pred, (h_t, c_t)


if __name__ == "__main__":
    batch, seq, input_sz, hidden_sz = 8, 8, 16, 32   # 4*HS = 128 -> lane-dense gates

    key = jax.random.PRNGKey(0)
    k_x, k_p = jax.random.split(key)
    x = jax.random.normal(k_x, (batch, seq, input_sz), jnp.float32)
    params = init_params(k_p, input_sz, hidden_sz)

    pred, (h_t, c_t) = custom_lstm_forward(x, params)
    jax.block_until_ready((pred, h_t, c_t))

    pred_ref, (h_ref, c_ref) = reference_forward(x, params)
    assert jnp.allclose(pred, pred_ref, atol=1e-5, rtol=1e-5)
    assert jnp.allclose(h_t, h_ref, atol=1e-5, rtol=1e-5)
    assert jnp.allclose(c_t, c_ref, atol=1e-5, rtol=1e-5)

    print("KERNEL_OK")
</pallas_src>

<mosaic_0001>
module attributes {stable_mosaic.version = 11 : i64} {
  func.func @_lstm_kernel(%arg0: i32, %arg1: i32, %arg2: memref<8x8x128xf32, #tpu.memory_space<vmem>>, %arg3: memref<32x128xf32, #tpu.memory_space<vmem>>, %arg4: memref<32x16xf32, #tpu.memory_space<vmem>>, %arg5: memref<1x16xf32, #tpu.memory_space<vmem>>, %arg6: memref<8x16xf32, #tpu.memory_space<vmem>>, %arg7: memref<8x32xf32, #tpu.memory_space<vmem>>, %arg8: memref<8x32xf32, #tpu.memory_space<vmem>>, %arg9: memref<8x32xf32, #tpu.memory_space<vmem>>, %arg10: memref<8x32xf32, #tpu.memory_space<vmem>>) attributes {dimension_semantics = [#tpu.dimension_semantics<parallel>, #tpu.dimension_semantics<arbitrary>], iteration_bounds = array<i64: 1, 1>, scalar_prefetch = 0 : i64, scratch_operands = 2 : i64, tpu.core_type = #tpu.core_type<tc>, window_params = [{transform_indices = @transform_0, window_bounds = array<i64: 8, 8, 128>}, {pipeline_mode = #tpu.pipeline_mode<synchronous>, transform_indices = @transform_1, window_bounds = array<i64: 32, 128>}, {pipeline_mode = #tpu.pipeline_mode<synchronous>, transform_indices = @transform_2, window_bounds = array<i64: 32, 16>}, {pipeline_mode = #tpu.pipeline_mode<synchronous>, transform_indices = @transform_3, window_bounds = array<i64: 1, 16>}, {transform_indices = @transform_4, window_bounds = array<i64: 8, 16>}, {transform_indices = @transform_5, window_bounds = array<i64: 8, 32>}, {transform_indices = @transform_6, window_bounds = array<i64: 8, 32>}]} {
    %c0_i32 = arith.constant 0 : i32
    %0 = arith.cmpi eq, %arg1, %c0_i32 : i32
    %1 = arith.extui %0 : i1 to i32
    %c0_i32_0 = arith.constant 0 : i32
    %2 = arith.cmpi ne, %1, %c0_i32_0 : i32
    scf.if %2 {
      %cst_44 = arith.constant 0.000000e+00 : f32
      %171 = vector.broadcast %cst_44 : f32 to vector<8x32xf32>
      %c0_45 = arith.constant 0 : index
      %c0_46 = arith.constant 0 : index
      %172 = vector.load %arg9[%c0_45, %c0_46] : memref<8x32xf32, #tpu.memory_space<vmem>>, vector<8x32xf32>
      tpu.vector_store %arg9[%c0_45, %c0_46], %171 {strides = array<i32>} : memref<8x32xf32, #tpu.memory_space<vmem>>, vector<8x32xf32>,
      %cst_47 = arith.constant 0.000000e+00 : f32
      %173 = vector.broadcast %cst_47 : f32 to vector<8x32xf32>
      %c0_48 = arith.constant 0 : index
      %c0_49 = arith.constant 0 : index
      %174 = vector.load %arg10[%c0_48, %c0_49] : memref<8x32xf32, #tpu.memory_space<vmem>>, vector<8x32xf32>
      tpu.vector_store %arg10[%c0_48, %c0_49], %173 {strides = array<i32>} : memref<8x32xf32, #tpu.memory_space<vmem>>, vector<8x32xf32>,
    } else {
    }
    %c0 = arith.constant 0 : index
    %c0_1 = arith.constant 0 : index
    %3 = vector.load %arg3[%c0, %c0_1] : memref<32x128xf32, #tpu.memory_space<vmem>>, vector<32x128xf32>
    %c0_2 = arith.constant 0 : index
    %c0_3 = arith.constant 0 : index
    %4 = vector.load %arg9[%c0_2, %c0_3] : memref<8x32xf32, #tpu.memory_space<vmem>>, vector<8x32xf32>
    %c0_4 = arith.constant 0 : index
    %c0_5 = arith.constant 0 : index
    %5 = vector.load %arg10[%c0_4, %c0_5] : memref<8x32xf32, #tpu.memory_space<vmem>>, vector<8x32xf32>
    %c0_i32_6 = arith.constant 0 : i32
    %6 = arith.index_cast %c0_i32_6 : i32 to index
    %c0_7 = arith.constant 0 : index
    %c0_8 = arith.constant 0 : index
    %7 = vector.load %arg2[%6, %c0_7, %c0_8] : memref<8x8x128xf32, #tpu.memory_space<vmem>>, vector<1x8x128xf32>
    %8 = vector.shape_cast %7 : vector<1x8x128xf32> to vector<8x128xf32>
    %cst = arith.constant dense<0.000000e+00> : vector<8x128xf32>
    %9 = tpu.matmul %4, %3, %cst {dimension_numbers = #tpu.dot_dimension_numbers<[1], [0], [0], [1], [0, 0, 1, 1], [], []>} : vector<8x32xf32>, vector<32x128xf32>, vector<8x128xf32> -> vector<8x128xf32>
    %10 = arith.addf %8, %9 : vector<8x128xf32>
    %11 = arith.negf %10 : vector<8x128xf32>
    %12 = math.exp %11 : vector<8x128xf32>
    %cst_9 = arith.constant 1.000000e+00 : f32
    %13 = vector.broadcast %cst_9 : f32 to vector<8x128xf32>
    %14 = arith.addf %13, %12 : vector<8x128xf32>
    %15 = arith.divf %13, %14 : vector<8x128xf32>
    %16 = math.tanh %10 : vector<8x128xf32>
    %17 = vector.extract_strided_slice %15 {offsets = [0, 0], sizes = [8, 32], strides = [1, 1]} : vector<8x128xf32> to vector<8x32xf32>
    %18 = vector.extract_strided_slice %15 {offsets = [0, 32], sizes = [8, 32], strides = [1, 1]} : vector<8x128xf32> to vector<8x32xf32>
    %19 = vector.extract_strided_slice %16 {offsets = [0, 64], sizes = [8, 32], strides = [1, 1]} : vector<8x128xf32> to vector<8x32xf32>
    %20 = vector.extract_strided_slice %15 {offsets = [0, 96], sizes = [8, 32], strides = [1, 1]} : vector<8x128xf32> to vector<8x32xf32>
    %21 = arith.mulf %18, %5 : vector<8x32xf32>
    %22 = arith.mulf %17, %19 : vector<8x32xf32>
    %23 = arith.addf %21, %22 : vector<8x32xf32>
    %24 = math.tanh %23 : vector<8x32xf32>
    %25 = arith.mulf %20, %24 : vector<8x32xf32>
    %c1_i32 = arith.constant 1 : i32
    %26 = arith.index_cast %c1_i32 : i32 to index
    %c0_10 = arith.constant 0 : index
    %c0_11 = arith.constant 0 : index
    %27 = vector.load %arg2[%26, %c0_10, %c0_11] : memref<8x8x128xf32, #tpu.memory_space<vmem>>, vector<1x8x128xf32>
    %28 = vector.shape_cast %27 : vector<1x8x128xf32> to vector<8x128xf32>
    %cst_12 = arith.constant dense<0.000000e+00> : vector<8x128xf32>
    %29 = tpu.matmul %25, %3, %cst_12 {dimension_numbers = #tpu.dot_dimension_numbers<[1], [0], [0], [1], [0, 0, 1, 1], [], []>} : vector<8x32xf32>, vector<32x128xf32>, vector<8x128xf32> -> vector<8x128xf32>
    %30 = arith.addf %28, %29 : vector<8x128xf32>
    %31 = arith.negf %30 : vector<8x128xf32>
    %32 = math.exp %31 : vector<8x128xf32>
    %cst_13 = arith.constant 1.000000e+00 : f32
    %33 = vector.broadcast %cst_13 : f32 to vector<8x128xf32>
    %34 = arith.addf %33, %32 : vector<8x128xf32>
    %35 = arith.divf %33, %34 : vector<8x128xf32>
    %36 = math.tanh %30 : vector<8x128xf32>
    %37 = vector.extract_strided_slice %35 {offsets = [0, 0], sizes = [8, 32], strides = [1, 1]} : vector<8x128xf32> to vector<8x32xf32>
    %38 = vector.extract_strided_slice %35 {offsets = [0, 32], sizes = [8, 32], strides = [1, 1]} : vector<8x128xf32> to vector<8x32xf32>
    %39 = vector.extract_strided_slice %36 {offsets = [0, 64], sizes = [8, 32], strides = [1, 1]} : vector<8x128xf32> to vector<8x32xf32>
    %40 = vector.extract_strided_slice %35 {offsets = [0, 96], sizes = [8, 32], strides = [1, 1]} : vector<8x128xf32> to vector<8x32xf32>
    %41 = arith.mulf %38, %23 : vector<8x32xf32>
    %42 = arith.mulf %37, %39 : vector<8x32xf32>
    %43 = arith.addf %41, %42 : vector<8x32xf32>
    %44 = math.tanh %43 : vector<8x32xf32>
    %45 = arith.mulf %40, %44 : vector<8x32xf32>
    %c2_i32 = arith.constant 2 : i32
    %46 = arith.index_cast %c2_i32 : i32 to index
    %c0_14 = arith.constant 0 : index
    %c0_15 = arith.constant 0 : index
    %47 = vector.load %arg2[%46, %c0_14, %c0_15] : memref<8x8x128xf32, #tpu.memory_space<vmem>>, vector<1x8x128xf32>
    %48 = vector.shape_cast %47 : vector<1x8x128xf32> to vector<8x128xf32>
    %cst_16 = arith.constant dense<0.000000e+00> : vector<8x128xf32>
    %49 = tpu.matmul %45, %3, %cst_16 {dimension_numbers = #tpu.dot_dimension_numbers<[1], [0], [0], [1], [0, 0, 1, 1], [], []>} : vector<8x32xf32>, vector<32x128xf32>, vector<8x128xf32> -> vector<8x128xf32>
    %50 = arith.addf %48, %49 : vector<8x128xf32>
    %51 = arith.negf %50 : vector<8x128xf32>
    %52 = math.exp %51 : vector<8x128xf32>
    %cst_17 = arith.constant 1.000000e+00 : f32
    %53 = vector.broadcast %cst_17 : f32 to vector<8x128xf32>
    %54 = arith.addf %53, %52 : vector<8x128xf32>
    %55 = arith.divf %53, %54 : vector<8x128xf32>
    %56 = math.tanh %50 : vector<8x128xf32>
    %57 = vector.extract_strided_slice %55 {offsets = [0, 0], sizes = [8, 32], strides = [1, 1]} : vector<8x128xf32> to vector<8x32xf32>
    %58 = vector.extract_strided_slice %55 {offsets = [0, 32], sizes = [8, 32], strides = [1, 1]} : vector<8x128xf32> to vector<8x32xf32>
    %59 = vector.extract_strided_slice %56 {offsets = [0, 64], sizes = [8, 32], strides = [1, 1]} : vector<8x128xf32> to vector<8x32xf32>
    %60 = vector.extract_strided_slice %55 {offsets = [0, 96], sizes = [8, 32], strides = [1, 1]} : vector<8x128xf32> to vector<8x32xf32>
    %61 = arith.mulf %58, %43 : vector<8x32xf32>
    %62 = arith.mulf %57, %59 : vector<8x32xf32>
    %63 = arith.addf %61, %62 : vector<8x32xf32>
    %64 = math.tanh %63 : vector<8x32xf32>
    %65 = arith.mulf %60, %64 : vector<8x32xf32>
    %c3_i32 = arith.constant 3 : i32
    %66 = arith.index_cast %c3_i32 : i32 to index
    %c0_18 = arith.constant 0 : index
    %c0_19 = arith.constant 0 : index
    %67 = vector.load %arg2[%66, %c0_18, %c0_19] : memref<8x8x128xf32, #tpu.memory_space<vmem>>, vector<1x8x128xf32>
    %68 = vector.shape_cast %67 : vector<1x8x128xf32> to vector<8x128xf32>
    %cst_20 = arith.constant dense<0.000000e+00> : vector<8x128xf32>
    %69 = tpu.matmul %65, %3, %cst_20 {dimension_numbers = #tpu.dot_dimension_numbers<[1], [0], [0], [1], [0, 0, 1, 1], [], []>} : vector<8x32xf32>, vector<32x128xf32>, vector<8x128xf32> -> vector<8x128xf32>
    %70 = arith.addf %68, %69 : vector<8x128xf32>
    %71 = arith.negf %70 : vector<8x128xf32>
    %72 = math.exp %71 : vector<8x128xf32>
    %cst_21 = arith.constant 1.000000e+00 : f32
    %73 = vector.broadcast %cst_21 : f32 to vector<8x128xf32>
    %74 = arith.addf %73, %72 : vector<8x128xf32>
    %75 = arith.divf %73, %74 : vector<8x128xf32>
    %76 = math.tanh %70 : vector<8x128xf32>
    %77 = vector.extract_strided_slice %75 {offsets = [0, 0], sizes = [8, 32], strides = [1, 1]} : vector<8x128xf32> to vector<8x32xf32>
    %78 = vector.extract_strided_slice %75 {offsets = [0, 32], sizes = [8, 32], strides = [1, 1]} : vector<8x128xf32> to vector<8x32xf32>
    %79 = vector.extract_strided_slice %76 {offsets = [0, 64], sizes = [8, 32], strides = [1, 1]} : vector<8x128xf32> to vector<8x32xf32>
    %80 = vector.extract_strided_slice %75 {offsets = [0, 96], sizes = [8, 32], strides = [1, 1]} : vector<8x128xf32> to vector<8x32xf32>
    %81 = arith.mulf %78, %63 : vector<8x32xf32>
    %82 = arith.mulf %77, %79 : vector<8x32xf32>
    %83 = arith.addf %81, %82 : vector<8x32xf32>
    %84 = math.tanh %83 : vector<8x32xf32>
    %85 = arith.mulf %80, %84 : vector<8x32xf32>
    %c4_i32 = arith.constant 4 : i32
    %86 = arith.index_cast %c4_i32 : i32 to index
    %c0_22 = arith.constant 0 : index
    %c0_23 = arith.constant 0 : index
    %87 = vector.load %arg2[%86, %c0_22, %c0_23] : memref<8x8x128xf32, #tpu.memory_space<vmem>>, vector<1x8x128xf32>
    %88 = vector.shape_cast %87 : vector<1x8x128xf32> to vector<8x128xf32>
    %cst_24 = arith.constant dense<0.000000e+00> : vector<8x128xf32>
    %89 = tpu.matmul %85, %3, %cst_24 {dimension_numbers = #tpu.dot_dimension_numbers<[1], [0], [0], [1], [0, 0, 1, 1], [], []>} : vector<8x32xf32>, vector<32x128xf32>, vector<8x128xf32> -> vector<8x128xf32>
    %90 = arith.addf %88, %89 : vector<8x128xf32>
    %91 = arith.negf %90 : vector<8x128xf32>
    %92 = math.exp %91 : vector<8x128xf32>
    %cst_25 = arith.constant 1.000000e+00 : f32
    %93 = vector.broadcast %cst_25 : f32 to vector<8x128xf32>
    %94 = arith.addf %93, %92 : vector<8x128xf32>
    %95 = arith.divf %93, %94 : vector<8x128xf32>
    %96 = math.tanh %90 : vector<8x128xf32>
    %97 = vector.extract_strided_slice %95 {offsets = [0, 0], sizes = [8, 32], strides = [1, 1]} : vector<8x128xf32> to vector<8x32xf32>
    %98 = vector.extract_strided_slice %95 {offsets = [0, 32], sizes = [8, 32], strides = [1, 1]} : vector<8x128xf32> to vector<8x32xf32>
    %99 = vector.extract_strided_slice %96 {offsets = [0, 64], sizes = [8, 32], strides = [1, 1]} : vector<8x128xf32> to vector<8x32xf32>
    %100 = vector.extract_strided_slice %95 {offsets = [0, 96], sizes = [8, 32], strides = [1, 1]} : vector<8x128xf32> to vector<8x32xf32>
    %101 = arith.mulf %98, %83 : vector<8x32xf32>
    %102 = arith.mulf %97, %99 : vector<8x32xf32>
    %103 = arith.addf %101, %102 : vector<8x32xf32>
    %104 = math.tanh %103 : vector<8x32xf32>
    %105 = arith.mulf %100, %104 : vector<8x32xf32>
    %c5_i32 = arith.constant 5 : i32
    %106 = arith.index_cast %c5_i32 : i32 to index
    %c0_26 = arith.constant 0 : index
    %c0_27 = arith.constant 0 : index
    %107 = vector.load %arg2[%106, %c0_26, %c0_27] : memref<8x8x128xf32, #tpu.memory_space<vmem>>, vector<1x8x128xf32>
    %108 = vector.shape_cast %107 : vector<1x8x128xf32> to vector<8x128xf32>
    %cst_28 = arith.constant dense<0.000000e+00> : vector<8x128xf32>
    %109 = tpu.matmul %105, %3, %cst_28 {dimension_numbers = #tpu.dot_dimension_numbers<[1], [0], [0], [1], [0, 0, 1, 1], [], []>} : vector<8x32xf32>, vector<32x128xf32>, vector<8x128xf32> -> vector<8x128xf32>
    %110 = arith.addf %108, %109 : vector<8x128xf32>
    %111 = arith.negf %110 : vector<8x128xf32>
    %112 = math.exp %111 : vector<8x128xf32>
    %cst_29 = arith.constant 1.000000e+00 : f32
    %113 = vector.broadcast %cst_29 : f32 to vector<8x128xf32>
    %114 = arith.addf %113, %112 : vector<8x128xf32>
    %115 = arith.divf %113, %114 : vector<8x128xf32>
    %116 = math.tanh %110 : vector<8x128xf32>
    %117 = vector.extract_strided_slice %115 {offsets = [0, 0], sizes = [8, 32], strides = [1, 1]} : vector<8x128xf32> to vector<8x32xf32>
    %118 = vector.extract_strided_slice %115 {offsets = [0, 32], sizes = [8, 32], strides = [1, 1]} : vector<8x128xf32> to vector<8x32xf32>
    %119 = vector.extract_strided_slice %116 {offsets = [0, 64], sizes = [8, 32], strides = [1, 1]} : vector<8x128xf32> to vector<8x32xf32>
    %120 = vector.extract_strided_slice %115 {offsets = [0, 96], sizes = [8, 32], strides = [1, 1]} : vector<8x128xf32> to vector<8x32xf32>
    %121 = arith.mulf %118, %103 : vector<8x32xf32>
    %122 = arith.mulf %117, %119 : vector<8x32xf32>
    %123 = arith.addf %121, %122 : vector<8x32xf32>
    %124 = math.tanh %123 : vector<8x32xf32>
    %125 = arith.mulf %120, %124 : vector<8x32xf32>
    %c6_i32 = arith.constant 6 : i32
    %126 = arith.index_cast %c6_i32 : i32 to index
    %c0_30 = arith.constant 0 : index
    %c0_31 = arith.constant 0 : index
    %127 = vector.load %arg2[%126, %c0_30, %c0_31] : memref<8x8x128xf32, #tpu.memory_space<vmem>>, vector<1x8x128xf32>
    %128 = vector.shape_cast %127 : vector<1x8x128xf32> to vector<8x128xf32>
    %cst_32 = arith.constant dense<0.000000e+00> : vector<8x128xf32>
    %129 = tpu.matmul %125, %3, %cst_32 {dimension_numbers = #tpu.dot_dimension_numbers<[1], [0], [0], [1], [0, 0, 1, 1], [], []>} : vector<8x32xf32>, vector<32x128xf32>, vector<8x128xf32> -> vector<8x128xf32>
    %130 = arith.addf %128, %129 : vector<8x128xf32>
    %131 = arith.negf %130 : vector<8x128xf32>
    %132 = math.exp %131 : vector<8x128xf32>
    %cst_33 = arith.constant 1.000000e+00 : f32
    %133 = vector.broadcast %cst_33 : f32 to vector<8x128xf32>
    %134 = arith.addf %133, %132 : vector<8x128xf32>
    %135 = arith.divf %133, %134 : vector<8x128xf32>
    %136 = math.tanh %130 : vector<8x128xf32>
    %137 = vector.extract_strided_slice %135 {offsets = [0, 0], sizes = [8, 32], strides = [1, 1]} : vector<8x128xf32> to vector<8x32xf32>
    %138 = vector.extract_strided_slice %135 {offsets = [0, 32], sizes = [8, 32], strides = [1, 1]} : vector<8x128xf32> to vector<8x32xf32>
    %139 = vector.extract_strided_slice %136 {offsets = [0, 64], sizes = [8, 32], strides = [1, 1]} : vector<8x128xf32> to vector<8x32xf32>
    %140 = vector.extract_strided_slice %135 {offsets = [0, 96], sizes = [8, 32], strides = [1, 1]} : vector<8x128xf32> to vector<8x32xf32>
    %141 = arith.mulf %138, %123 : vector<8x32xf32>
    %142 = arith.mulf %137, %139 : vector<8x32xf32>
    %143 = arith.addf %141, %142 : vector<8x32xf32>
    %144 = math.tanh %143 : vector<8x32xf32>
    %145 = arith.mulf %140, %144 : vector<8x32xf32>
    %c7_i32 = arith.constant 7 : i32
    %146 = arith.index_cast %c7_i32 : i32 to index
    %c0_34 = arith.constant 0 : index
    %c0_35 = arith.constant 0 : index
    %147 = vector.load %arg2[%146, %c0_34, %c0_35] : memref<8x8x128xf32, #tpu.memory_space<vmem>>, vector<1x8x128xf32>
    %148 = vector.shape_cast %147 : vector<1x8x128xf32> to vector<8x128xf32>
    %cst_36 = arith.constant dense<0.000000e+00> : vector<8x128xf32>
    %149 = tpu.matmul %145, %3, %cst_36 {dimension_numbers = #tpu.dot_dimension_numbers<[1], [0], [0], [1], [0, 0, 1, 1], [], []>} : vector<8x32xf32>, vector<32x128xf32>, vector<8x128xf32> -> vector<8x128xf32>
    %150 = arith.addf %148, %149 : vector<8x128xf32>
    %151 = arith.negf %150 : vector<8x128xf32>
    %152 = math.exp %151 : vector<8x128xf32>
    %cst_37 = arith.constant 1.000000e+00 : f32
    %153 = vector.broadcast %cst_37 : f32 to vector<8x128xf32>
    %154 = arith.addf %153, %152 : vector<8x128xf32>
    %155 = arith.divf %153, %154 : vector<8x128xf32>
    %156 = math.tanh %150 : vector<8x128xf32>
    %157 = vector.extract_strided_slice %155 {offsets = [0, 0], sizes = [8, 32], strides = [1, 1]} : vector<8x128xf32> to vector<8x32xf32>
    %158 = vector.extract_strided_slice %155 {offsets = [0, 32], sizes = [8, 32], strides = [1, 1]} : vector<8x128xf32> to vector<8x32xf32>
    %159 = vector.extract_strided_slice %156 {offsets = [0, 64], sizes = [8, 32], strides = [1, 1]} : vector<8x128xf32> to vector<8x32xf32>
    %160 = vector.extract_strided_slice %155 {offsets = [0, 96], sizes = [8, 32], strides = [1, 1]} : vector<8x128xf32> to vector<8x32xf32>
    %161 = arith.mulf %158, %143 : vector<8x32xf32>
    %162 = arith.mulf %157, %159 : vector<8x32xf32>
    %163 = arith.addf %161, %162 : vector<8x32xf32>
    %164 = math.tanh %163 : vector<8x32xf32>
    %165 = arith.mulf %160, %164 : vector<8x32xf32>
    %c8_i32 = arith.constant 8 : i32
    %c0_38 = arith.constant 0 : index
    %c0_39 = arith.constant 0 : index
    %166 = vector.load %arg9[%c0_38, %c0_39] : memref<8x32xf32, #tpu.memory_space<vmem>>, vector<8x32xf32>
    tpu.vector_store %arg9[%c0_38, %c0_39], %165 {strides = array<i32>} : memref<8x32xf32, #tpu.memory_space<vmem>>, vector<8x32xf32>,
    %c0_40 = arith.constant 0 : index
    %c0_41 = arith.constant 0 : index
    %167 = vector.load %arg10[%c0_40, %c0_41] : memref<8x32xf32, #tpu.memory_space<vmem>>, vector<8x32xf32>
    tpu.vector_store %arg10[%c0_40, %c0_41], %163 {strides = array<i32>} : memref<8x32xf32, #tpu.memory_space<vmem>>, vector<8x32xf32>,
    %c0_i32_42 = arith.constant 0 : i32
    %168 = arith.cmpi eq, %arg1, %c0_i32_42 : i32
    %169 = arith.extui %168 : i1 to i32
    %c0_i32_43 = arith.constant 0 : i32
    %170 = arith.cmpi ne, %169, %c0_i32_43 : i32
    scf.if %170 {
      %c0_44 = arith.constant 0 : index
      %c0_45 = arith.constant 0 : index
      %171 = vector.load %arg7[%c0_44, %c0_45] : memref<8x32xf32, #tpu.memory_space<vmem>>, vector<8x32xf32>
      tpu.vector_store %arg7[%c0_44, %c0_45], %165 {strides = array<i32>} : memref<8x32xf32, #tpu.memory_space<vmem>>, vector<8x32xf32>,
      %c0_46 = arith.constant 0 : index
      %c0_47 = arith.constant 0 : index
      %172 = vector.load %arg8[%c0_46, %c0_47] : memref<8x32xf32, #tpu.memory_space<vmem>>, vector<8x32xf32>
      tpu.vector_store %arg8[%c0_46, %c0_47], %163 {strides = array<i32>} : memref<8x32xf32, #tpu.memory_space<vmem>>, vector<8x32xf32>,
      %c0_48 = arith.constant 0 : index
      %c0_49 = arith.constant 0 : index
      %173 = vector.load %arg4[%c0_48, %c0_49] : memref<32x16xf32, #tpu.memory_space<vmem>>, vector<32x16xf32>
      %cst_50 = arith.constant dense<0.000000e+00> : vector<8x16xf32>
      %174 = tpu.matmul %165, %173, %cst_50 {dimension_numbers = #tpu.dot_dimension_numbers<[1], [0], [0], [1], [0, 0, 1, 1], [], []>} : vector<8x32xf32>, vector<32x16xf32>, vector<8x16xf32> -> vector<8x16xf32>
      %c0_51 = arith.constant 0 : index
      %c0_52 = arith.constant 0 : index
      %175 = vector.load %arg5[%c0_51, %c0_52] : memref<1x16xf32, #tpu.memory_space<vmem>>, vector<1x16xf32>
      %176 = vector.broadcast %175 : vector<1x16xf32> to vector<8x16xf32>
      %177 = arith.addf %174, %176 : vector<8x16xf32>
      %c0_53 = arith.constant 0 : index
      %c0_54 = arith.constant 0 : index
      %178 = vector.load %arg6[%c0_53, %c0_54] : memref<8x16xf32, #tpu.memory_space<vmem>>, vector<8x16xf32>
      tpu.vector_store %arg6[%c0_53, %c0_54], %177 {strides = array<i32>} : memref<8x16xf32, #tpu.memory_space<vmem>>, vector<8x16xf32>,
    } else {
    }
    return
  }
  func.func @transform_0(%arg0: i32, %arg1: i32) -> (i32, i32, i32) {
    %c0_i32 = arith.constant 0 : i32
    %c0_i32_0 = arith.constant 0 : i32
    return %arg1, %arg0, %c0_i32 : i32, i32, i32
  }
  func.func @transform_1(%arg0: i32, %arg1: i32) -> (i32, i32) {
    %c0_i32 = arith.constant 0 : i32
    %c0_i32_0 = arith.constant 0 : i32
    %c0_i32_1 = arith.constant 0 : i32
    return %c0_i32, %c0_i32_0 : i32, i32
  }
  func.func @transform_2(%arg0: i32, %arg1: i32) -> (i32, i32) {
    %c0_i32 = arith.constant 0 : i32
    %c0_i32_0 = arith.constant 0 : i32
    %c0_i32_1 = arith.constant 0 : i32
    return %c0_i32, %c0_i32_0 : i32, i32
  }
  func.func @transform_3(%arg0: i32, %arg1: i32) -> (i32, i32) {
    %c0_i32 = arith.constant 0 : i32
    %c0_i32_0 = arith.constant 0 : i32
    %c0_i32_1 = arith.constant 0 : i32
    return %c0_i32, %c0_i32_0 : i32, i32
  }
  func.func @transform_4(%arg0: i32, %arg1: i32) -> (i32, i32) {
    %c0_i32 = arith.constant 0 : i32
    %c0_i32_0 = arith.constant 0 : i32
    return %arg0, %c0_i32 : i32, i32
  }
  func.func @transform_5(%arg0: i32, %arg1: i32) -> (i32, i32) {
    %c0_i32 = arith.constant 0 : i32
    %c0_i32_0 = arith.constant 0 : i32
    return %arg0, %c0_i32 : i32, i32
  }
  func.func @transform_6(%arg0: i32, %arg1: i32) -> (i32, i32) {
    %c0_i32 = arith.constant 0 : i32
    %c0_i32_0 = arith.constant 0 : i32
    return %arg0, %c0_i32 : i32, i32
  }
}

</mosaic_0001>

<bundles_post_ra>
// kernel: tpu_custom_call.1
= control target key start
LH: loop header
LB: loop body
LE: loop exit
PB: predicated region body
PF: predicated region fallthrough
CT: control target
= control target key end

     0   :  { %12 = vsyncpa [#allocation5], 0  ;;  %s994_s0 = inlined_call_operand.hbm [shape: f32[8,8,128], index: 0, kind: input, shape index: {}]   ;;  %s995_s1 = inlined_call_operand.vmem [shape: f32[32,128], index: 1, kind: input, shape index: {}]   ;;  %s996_s2 = inlined_call_operand.vmem [shape: f32[32,16], index: 2, kind: input, shape index: {}]   ;;  %s997_s3 = inlined_call_operand.vmem [shape: f32[1,16], index: 3, kind: input, shape index: {}]   ;;  %s998_s4 = inlined_call_operand.hbm [shape: f32[8,16], index: 4, kind: output, shape index: {0}]   ;;  %s999_s5 = inlined_call_operand.hbm [shape: f32[8,32], index: 5, kind: output, shape index: {1}]   ;;  %s1000_s6 = inlined_call_operand.hbm [shape: f32[8,32], index: 6, kind: output, shape index: {2}]  }
   0x1   :  { %13 = vsyncpa [#allocation6], 0 }
   0x2   :  { %14 = vsyncpa [#allocation9], 0  ;;  %s19_s23 = sshll.u32 %s994_s0, 4  ;;  %s862_s24 = smov [#allocation4]   ;;  %s20_s23 = int_to_ptr.hbm [resolvable:$true] %s19_s23 }
   0x3   :  { %s21_s25 = sshll.u32 %s862_s24, 4  ;;  %s863_s26 = smov 128   ;;  %s22_s25 = int_to_ptr.vmem [resolvable:$true] %s21_s25 }
   0x4   :  { %s864_s27 = smov 8  }
   0x5   :  { %27 = dma.hbm_to_vmem [thread:$0]  %s20_s23, 1024, %s22_s25, [#allocation5], %s863_s26, %s863_s26, %s864_s27  }
   0x6   :  { %856 = dma.done.wait [#allocation5], 1024  }
   0x7   :  { %857 = vsyncadd [#allocation5], 4294966272  ;;  %vm42_vm0 = vcmask 261120   ;;  %v865_v0 = vmov 0.0   ;;  %v48_v1 = vld [vmem:[%s995_s1 + $0x18] sm:$0xff]  ;;  %v47_v2 = vld [vmem:[%s995_s1 + $0x10] sm:$0xff] }
   0x8   :  { %43 = vst.msk [vmem:[#allocation2] sm:$0xff] %vm42_vm0, %v865_v0  ;;  %68 = vmatpush.msra.mxu0 %v48_v1  ;;  %137 = vmatpush.msra.mxu1 %v48_v1  ;;  %v46_v3 = vld [vmem:[%s995_s1 + $0x8] sm:$0xff]  ;;  %v45_v4 = vld [vmem:[%s995_s1] sm:$0xff]  ;;  %v51_v6 = vld [vmem:[#allocation4] sm:$0xff]  ;;  %s866_s1 = smov 64   ;;  %s867_s11 = smov 32  }
   0x9   :  { %44 = vst.msk [vmem:[#allocation3] sm:$0xff] %vm42_vm0, %v865_v0  ;;  %202 = vmatpush.msra.mxu2 %v48_v1  ;;  %267 = vmatpush.msra.mxu3 %v48_v1  ;;  %v119_v34 = vld [vmem:[#allocation4 + $0x8] sm:$0xff]  ;;  %v184_v60 = vld [vmem:[#allocation4 + $0x10] sm:$0xff]  ;;  %s868_s12 = smov 96   ;;  %s638_s23 = sshll.u32 %s999_s5, 4  ;;  %s639_s23 = int_to_ptr.hbm [resolvable:$true] %s638_s23 }
   0xa   :  { %69 = vmatpush.msra.mxu0 %v47_v2  ;;  %138 = vmatpush.msra.mxu1 %v47_v2  ;;  %s869_s24 = smov [#allocation8]   ;;  %s649_s27 = sshll.u32 %s1000_s6, 4  ;;  %s650_s27 = int_to_ptr.hbm [resolvable:$true] %s649_s27 }
   0xb   :  { %203 = vmatpush.msra.mxu2 %v47_v2  ;;  %268 = vmatpush.msra.mxu3 %v47_v2  ;;  %s636_s25 = sshll.u32 %s869_s24, 4  ;;  %s870_s28 = smov [#allocation10]   ;;  %s637_s25 = int_to_ptr.vmem [resolvable:$true] %s636_s25 }
   0xc   :  { %70 = vmatpush.msra.mxu0 %v46_v3  ;;  %139 = vmatpush.msra.mxu1 %v46_v3  ;;  %s647_s29 = sshll.u32 %s870_s28, 4  ;;  %s871_s30 = smov [#allocation7]   ;;  %s648_s29 = int_to_ptr.vmem [resolvable:$true] %s647_s29 }
   0xd   :  { %204 = vmatpush.msra.mxu2 %v46_v3  ;;  %269 = vmatpush.msra.mxu3 %v46_v3  ;;  %s625_s7 = sshll.u32 %s871_s30, 4  ;;  %s627_s10 = sshll.u32 %s998_s4, 4  ;;  %s626_s7 = int_to_ptr.vmem [resolvable:$true] %s625_s7  ;;  %s628_s10 = int_to_ptr.hbm [resolvable:$true] %s627_s10 }
   0xe   :  { %71 = vmatpush.msra.mxu0 %v45_v4  ;;  %140 = vmatpush.msra.mxu1 %v45_v4 }
   0xf   :  { %v49_v5 = vld [vmem:[#allocation2] sm:$0xff]  ;;  %205 = vmatpush.msra.mxu2 %v45_v4  ;;  %270 = vmatpush.msra.mxu3 %v45_v4 }
  0x10   :  { %668 = vmatmul.msk.f32.vlgmr.msra.gmra.mxu0 %vm42_vm0, %v49_v5  ;;  %397 = vmatpush.msrb.mxu1 %v48_v1  ;;  %v50_v10 = vld [vmem:[#allocation3] sm:$0xff] }
  0x11   :  { %332 = vmatpush.msrb.mxu0 %v48_v1  ;;  %462 = vmatpush.msrb.mxu2 %v48_v1 }
  0x12   :  { %527 = vmatpush.msrb.mxu3 %v48_v1  ;;  %398 = vmatpush.msrb.mxu1 %v47_v2 }
  0x13   :  { %333 = vmatpush.msrb.mxu0 %v47_v2  ;;  %463 = vmatpush.msrb.mxu2 %v47_v2 }
  0x14   :  { %528 = vmatpush.msrb.mxu3 %v47_v2  ;;  %399 = vmatpush.msrb.mxu1 %v46_v3 }
  0x15   :  { %334 = vmatpush.msrb.mxu0 %v46_v3  ;;  %464 = vmatpush.msrb.mxu2 %v46_v3 }
  0x16   :  { %529 = vmatpush.msrb.mxu3 %v46_v3  ;;  %400 = vmatpush.msrb.mxu1 %v45_v4 }
  0x17   :  { %335 = vmatpush.msrb.mxu0 %v45_v4  ;;  %465 = vmatpush.msrb.mxu2 %v45_v4 }
  0x18   :  { %530 = vmatpush.msrb.mxu3 %v45_v4 }
  0x8d   :  { %v73_v7 = vpop.f32.mrf.mxu0 }
  0x8e   :  { %v76_v8 = vadd.f32 %v73_v7, %v51_v6 }
  0x90   :  { %696 = vtanh.f32 %v76_v8  ;;  %v669_v11 = vmul.f32 -1.442695, %v76_v8 }
  0x92   :  { %698 = vpow2.f32 %v669_v11 }
  0x96   :  { %v697_v9 = vpop.eup %696 }
  0x97   :  { %103 = vrot.lane.b32.xlu0 %v697_v9, %s866_s1 }
  0x98   :  { %v699_v12 = vpop.eup %698 }
  0x99   :  { %v80_v13 = vadd.f32 1.0, %v699_v12 }
  0x9b   :  { %700 = vrcp.f32 %v80_v13  ;;  %v92_v19 = vand.u32 2147483648, %v80_v13  ;;  %vm86_vm2 = vweird.f32 %v80_v13  ;;  %v90_v20 = vand.u32 2147483647, %v80_v13 }
  0x9d   :  { %v93_v22 = vor.u32 1.1754944e-38, %v92_v19  ;;  %vm91_vm4 = vcmp.eq.f32.partialorder %v90_v20, 8.507059e+37 }
  0x9f   :  { %98 = vrot.lane.b32.xlu0 %v50_v10, %s867_s11 }
  0xa1   :  { %v701_v14 = vpop.eup %700 }
  0xa2   :  { %v82_v15 = vmul.f32 %v701_v14, %v80_v13  ;;  %vm87_vm1 = vweird.f32 %v701_v14 }
  0xa3   :  { %vm88_vm3 = vmor %vm86_vm2, %vm87_vm1 }
  0xa4   :  { %v83_v16 = vsub.f32 1.0, %v82_v15 }
  0xa6   :  { %v84_v17 = vmul.f32 %v701_v14, %v83_v16 }
  0xa8   :  { %v85_v18 = vadd.f32 %v701_v14, %v84_v17 }
  0xaa   :  { %v89_v21 = vsel %vm88_vm3, %v701_v14, %v85_v18 }
  0xab   :  { %v94_v24 = vsel %vm91_vm4, %v93_v22, %v89_v21  ;;  %v249_v22 = vld [vmem:[#allocation4 + $0x18] sm:$0xff] }
 0x109   :  { %v104_v23 = vpop.permute.xlu0 %103 }
 0x10a   :  { %v106_v25 = vmul.f32 %v104_v23, %v94_v24 }
 0x10c   :  { %108 = vrot.lane.b32.xlu1 %v106_v25, %s867_s11 }
 0x111   :  { %v99_v26 = vpop.permute.xlu0 %98 }
 0x112   :  { %v101_v27 = vmul.f32 %v99_v26, %v94_v24 }
 0x17e   :  { %v109_v28 = vpop.permute.xlu1 %108 }
 0x17f   :  { %v111_v29 = vadd.f32 %v109_v28, %v101_v27 }
 0x181   :  { %702 = vtanh.f32 %v111_v29 }
 0x187   :  { %v703_v30 = vpop.eup %702 }
 0x188   :  { %114 = vrot.lane.b32.xlu1 %v703_v30, %s866_s1 }
 0x1fa   :  { %v115_v31 = vpop.permute.xlu1 %114 }
 0x1fb   :  { %v117_v32 = vmul.f32 %v115_v31, %v94_v24 }
 0x1fd   :  { %121 = vrot.lane.b32.xlu2 %v117_v32, %s867_s11 }
 0x257   :  { %v122_v33 = vpop.permute.xlu2 %121 }
 0x258   :  { %670 = vmatmul.msk.f32.vlgmr.msra.gmra.mxu1 %vm42_vm0, %v122_v33 }
 0x2d5   :  { %v142_v35 = vpop.f32.mrf.mxu1 }
 0x2d6   :  { %v145_v36 = vadd.f32 %v142_v35, %v119_v34 }
 0x2d8   :  { %704 = vtanh.f32 %v145_v36  ;;  %v671_v38 = vmul.f32 -1.442695, %v145_v36 }
 0x2da   :  { %706 = vpow2.f32 %v671_v38 }
 0x2de   :  { %v705_v37 = vpop.eup %704 }
 0x2df   :  { %168 = vrot.lane.b32.xlu2 %v705_v37, %s866_s1 }
 0x2e0   :  { %v707_v39 = vpop.eup %706 }
 0x2e1   :  { %v149_v40 = vadd.f32 1.0, %v707_v39 }
 0x2e3   :  { %708 = vrcp.f32 %v149_v40  ;;  %v161_v46 = vand.u32 2147483648, %v149_v40  ;;  %vm155_vm6 = vweird.f32 %v149_v40  ;;  %v159_v47 = vand.u32 2147483647, %v149_v40 }
 0x2e5   :  { %v162_v49 = vor.u32 1.1754944e-38, %v161_v46  ;;  %vm160_vm8 = vcmp.eq.f32.partialorder %v159_v47, 8.507059e+37 }
 0x2e9   :  { %v709_v41 = vpop.eup %708 }
 0x2ea   :  { %v151_v42 = vmul.f32 %v709_v41, %v149_v40  ;;  %vm156_vm5 = vweird.f32 %v709_v41 }
 0x2eb   :  { %vm157_vm7 = vmor %vm155_vm6, %vm156_vm5 }
 0x2ec   :  { %v152_v43 = vsub.f32 1.0, %v151_v42 }
 0x2ee   :  { %v153_v44 = vmul.f32 %v709_v41, %v152_v43 }
 0x2f0   :  { %v154_v45 = vadd.f32 %v709_v41, %v153_v44 }
 0x2f2   :  { %v158_v48 = vsel %vm157_vm7, %v709_v41, %v154_v45 }
 0x2f3   :  { %v163_v51 = vsel %vm160_vm8, %v162_v49, %v158_v48  ;;  %v314_v48 = vld [vmem:[#allocation4 + $0x20] sm:$0xff] }
 0x2f4   :  { %v166_v53 = vmul.f32 %v163_v51, %v111_v29 }
 0x339   :  { %v169_v50 = vpop.permute.xlu2 %168 }
 0x33a   :  { %v171_v52 = vmul.f32 %v169_v50, %v163_v51 }
 0x33c   :  { %173 = vrot.lane.b32.xlu0 %v171_v52, %s867_s11 }
 0x3ae   :  { %v174_v54 = vpop.permute.xlu0 %173 }
 0x3af   :  { %v176_v55 = vadd.f32 %v174_v54, %v166_v53 }
 0x3b1   :  { %710 = vtanh.f32 %v176_v55 }
 0x3b7   :  { %v711_v56 = vpop.eup %710 }
 0x3b8   :  { %179 = vrot.lane.b32.xlu1 %v711_v56, %s866_s1 }
 0x42a   :  { %v180_v57 = vpop.permute.xlu1 %179 }
 0x42b   :  { %v182_v58 = vmul.f32 %v180_v57, %v163_v51 }
 0x42d   :  { %186 = vrot.lane.b32.xlu2 %v182_v58, %s867_s11 }
 0x487   :  { %v187_v59 = vpop.permute.xlu2 %186 }
 0x488   :  { %672 = vmatmul.msk.f32.vlgmr.msra.gmra.mxu2 %vm42_vm0, %v187_v59 }
 0x50b   :  { %v207_v61 = vpop.f32.mrf.mxu2 }
 0x50c   :  { %v210_v62 = vadd.f32 %v207_v61, %v184_v60 }
 0x50e   :  { %712 = vtanh.f32 %v210_v62  ;;  %v673_v0 = vmul.f32 -1.442695, %v210_v62 }
 0x510   :  { %714 = vpow2.f32 %v673_v0 }
 0x514   :  { %v713_v63 = vpop.eup %712 }
 0x515   :  { %233 = vrot.lane.b32.xlu0 %v713_v63, %s866_s1 }
 0x516   :  { %v715_v1 = vpop.eup %714 }
 0x517   :  { %v214_v2 = vadd.f32 1.0, %v715_v1 }
 0x519   :  { %716 = vrcp.f32 %v214_v2  ;;  %v226_v8 = vand.u32 2147483648, %v214_v2  ;;  %vm220_vm10 = vweird.f32 %v214_v2  ;;  %v224_v9 = vand.u32 2147483647, %v214_v2 }
 0x51b   :  { %v227_v11 = vor.u32 1.1754944e-38, %v226_v8  ;;  %vm225_vm12 = vcmp.eq.f32.partialorder %v224_v9, 8.507059e+37 }
 0x51f   :  { %v717_v3 = vpop.eup %716 }
 0x520   :  { %v216_v4 = vmul.f32 %v717_v3, %v214_v2  ;;  %vm221_vm9 = vweird.f32 %v717_v3 }
 0x521   :  { %vm222_vm11 = vmor %vm220_vm10, %vm221_vm9 }
 0x522   :  { %v217_v5 = vsub.f32 1.0, %v216_v4 }
 0x524   :  { %v218_v6 = vmul.f32 %v717_v3, %v217_v5 }
 0x526   :  { %v219_v7 = vadd.f32 %v717_v3, %v218_v6 }
 0x528   :  { %v223_v10 = vsel %vm222_vm11, %v717_v3, %v219_v7 }
 0x529   :  { %v228_v13 = vsel %vm225_vm12, %v227_v11, %v223_v10  ;;  %v379_v10 = vld [vmem:[#allocation4 + $0x28] sm:$0xff] }
 0x52a   :  { %v231_v15 = vmul.f32 %v228_v13, %v176_v55 }
 0x587   :  { %v234_v12 = vpop.permute.xlu0 %233 }
 0x588   :  { %v236_v14 = vmul.f32 %v234_v12, %v228_v13 }
 0x58a   :  { %238 = vrot.lane.b32.xlu1 %v236_v14, %s867_s11 }
 0x5fc   :  { %v239_v16 = vpop.permute.xlu1 %238 }
 0x5fd   :  { %v241_v17 = vadd.f32 %v239_v16, %v231_v15 }
 0x5ff   :  { %718 = vtanh.f32 %v241_v17 }
 0x605   :  { %v719_v18 = vpop.eup %718 }
 0x606   :  { %244 = vrot.lane.b32.xlu2 %v719_v18, %s866_s1 }
 0x660   :  { %v245_v19 = vpop.permute.xlu2 %244 }
 0x661   :  { %v247_v20 = vmul.f32 %v245_v19, %v228_v13 }
 0x663   :  { %251 = vrot.lane.b32.xlu0 %v247_v20, %s867_s11 }
 0x6d5   :  { %v252_v21 = vpop.permute.xlu0 %251 }
 0x6d6   :  { %674 = vmatmul.msk.f32.vlgmr.msra.gmra.mxu3 %vm42_vm0, %v252_v21 }
 0x759   :  { %v272_v23 = vpop.f32.mrf.mxu3 }
 0x75a   :  { %v275_v24 = vadd.f32 %v272_v23, %v249_v22 }
 0x75c   :  { %720 = vtanh.f32 %v275_v24  ;;  %v675_v26 = vmul.f32 -1.442695, %v275_v24 }
 0x75e   :  { %722 = vpow2.f32 %v675_v26 }
 0x762   :  { %v721_v25 = vpop.eup %720 }
 0x763   :  { %298 = vrot.lane.b32.xlu1 %v721_v25, %s866_s1 }
 0x764   :  { %v723_v27 = vpop.eup %722 }
 0x765   :  { %v279_v28 = vadd.f32 1.0, %v723_v27 }
 0x767   :  { %724 = vrcp.f32 %v279_v28  ;;  %v291_v34 = vand.u32 2147483648, %v279_v28  ;;  %vm285_vm14 = vweird.f32 %v279_v28  ;;  %v289_v35 = vand.u32 2147483647, %v279_v28 }
 0x769   :  { %v292_v37 = vor.u32 1.1754944e-38, %v291_v34  ;;  %vm290_vm1 = vcmp.eq.f32.partialorder %v289_v35, 8.507059e+37 }
 0x76d   :  { %v725_v29 = vpop.eup %724 }
 0x76e   :  { %v281_v30 = vmul.f32 %v725_v29, %v279_v28  ;;  %vm286_vm13 = vweird.f32 %v725_v29 }
 0x76f   :  { %vm287_vm15 = vmor %vm285_vm14, %vm286_vm13 }
 0x770   :  { %v282_v31 = vsub.f32 1.0, %v281_v30 }
 0x772   :  { %v283_v32 = vmul.f32 %v725_v29, %v282_v31 }
 0x774   :  { %v284_v33 = vadd.f32 %v725_v29, %v283_v32 }
 0x776   :  { %v288_v36 = vsel %vm287_vm15, %v725_v29, %v284_v33 }
 0x777   :  { %v293_v39 = vsel %vm290_vm1, %v292_v37, %v288_v36  ;;  %v444_v36 = vld [vmem:[#allocation4 + $0x30] sm:$0xff] }
 0x778   :  { %v296_v41 = vmul.f32 %v293_v39, %v241_v17 }
 0x7d5   :  { %v299_v38 = vpop.permute.xlu1 %298 }
 0x7d6   :  { %v301_v40 = vmul.f32 %v299_v38, %v293_v39 }
 0x7d8   :  { %303 = vrot.lane.b32.xlu2 %v301_v40, %s867_s11 }
 0x832   :  { %v304_v42 = vpop.permute.xlu2 %303 }
 0x833   :  { %v306_v43 = vadd.f32 %v304_v42, %v296_v41 }
 0x835   :  { %726 = vtanh.f32 %v306_v43 }
 0x83b   :  { %v727_v44 = vpop.eup %726 }
 0x83c   :  { %309 = vrot.lane.b32.xlu0 %v727_v44, %s866_s1 }
 0x8ae   :  { %v310_v45 = vpop.permute.xlu0 %309 }
 0x8af   :  { %v312_v46 = vmul.f32 %v310_v45, %v293_v39 }
 0x8b1   :  { %316 = vrot.lane.b32.xlu1 %v312_v46, %s867_s11 }
 0x923   :  { %v317_v47 = vpop.permute.xlu1 %316 }
 0x924   :  { %676 = vmatmul.msk.f32.vlgmr.msrb.gmra.mxu0 %vm42_vm0, %v317_v47 }
 0x9a1   :  { %v337_v49 = vpop.f32.mrf.mxu0 }
 0x9a2   :  { %v340_v50 = vadd.f32 %v337_v49, %v314_v48 }
 0x9a4   :  { %728 = vtanh.f32 %v340_v50  ;;  %v677_v52 = vmul.f32 -1.442695, %v340_v50 }
 0x9a6   :  { %730 = vpow2.f32 %v677_v52 }
 0x9aa   :  { %v729_v51 = vpop.eup %728 }
 0x9ab   :  { %363 = vrot.lane.b32.xlu2 %v729_v51, %s866_s1 }
 0x9ac   :  { %v731_v53 = vpop.eup %730 }
 0x9ad   :  { %v344_v54 = vadd.f32 1.0, %v731_v53 }
 0x9af   :  { %732 = vrcp.f32 %v344_v54  ;;  %v356_v60 = vand.u32 2147483648, %v344_v54  ;;  %vm350_vm3 = vweird.f32 %v344_v54  ;;  %v354_v61 = vand.u32 2147483647, %v344_v54 }
 0x9b1   :  { %v357_v63 = vor.u32 1.1754944e-38, %v356_v60  ;;  %vm355_vm5 = vcmp.eq.f32.partialorder %v354_v61, 8.507059e+37 }
 0x9b5   :  { %v733_v55 = vpop.eup %732 }
 0x9b6   :  { %v346_v56 = vmul.f32 %v733_v55, %v344_v54  ;;  %vm351_vm2 = vweird.f32 %v733_v55 }
 0x9b7   :  { %vm352_vm4 = vmor %vm350_vm3, %vm351_vm2 }
 0x9b8   :  { %v347_v57 = vsub.f32 1.0, %v346_v56 }
 0x9ba   :  { %v348_v58 = vmul.f32 %v733_v55, %v347_v57 }
 0x9bc   :  { %v349_v59 = vadd.f32 %v733_v55, %v348_v58 }
 0x9be   :  { %v353_v62 = vsel %vm352_vm4, %v733_v55, %v349_v59 }
 0x9bf   :  { %v358_v1 = vsel %vm355_vm5, %v357_v63, %v353_v62  ;;  %v509_v62 = vld [vmem:[#allocation4 + $0x38] sm:$0xff] }
 0x9c0   :  { %v361_v3 = vmul.f32 %v358_v1, %v306_v43 }
 0xa05   :  { %v364_v0 = vpop.permute.xlu2 %363 }
 0xa06   :  { %v366_v2 = vmul.f32 %v364_v0, %v358_v1 }
 0xa08   :  { %368 = vrot.lane.b32.xlu0 %v366_v2, %s867_s11 }
 0xa7a   :  { %v369_v4 = vpop.permute.xlu0 %368 }
 0xa7b   :  { %v371_v5 = vadd.f32 %v369_v4, %v361_v3 }
 0xa7d   :  { %734 = vtanh.f32 %v371_v5 }
 0xa83   :  { %v735_v6 = vpop.eup %734 }
 0xa84   :  { %374 = vrot.lane.b32.xlu1 %v735_v6, %s866_s1 }
 0xaf6   :  { %v375_v7 = vpop.permute.xlu1 %374 }
 0xaf7   :  { %v377_v8 = vmul.f32 %v375_v7, %v358_v1 }
 0xaf9   :  { %381 = vrot.lane.b32.xlu2 %v377_v8, %s867_s11 }
 0xb53   :  { %v382_v9 = vpop.permute.xlu2 %381 }
 0xb54   :  { %678 = vmatmul.msk.f32.vlgmr.msrb.gmra.mxu1 %vm42_vm0, %v382_v9 }
 0xbd1   :  { %v402_v11 = vpop.f32.mrf.mxu1 }
 0xbd2   :  { %v405_v12 = vadd.f32 %v402_v11, %v379_v10 }
 0xbd4   :  { %736 = vtanh.f32 %v405_v12  ;;  %v679_v14 = vmul.f32 -1.442695, %v405_v12 }
 0xbd6   :  { %738 = vpow2.f32 %v679_v14 }
 0xbda   :  { %v737_v13 = vpop.eup %736 }
 0xbdb   :  { %428 = vrot.lane.b32.xlu0 %v737_v13, %s866_s1 }
 0xbdc   :  { %v739_v15 = vpop.eup %738 }
 0xbdd   :  { %v409_v16 = vadd.f32 1.0, %v739_v15 }
 0xbdf   :  { %740 = vrcp.f32 %v409_v16  ;;  %v421_v22 = vand.u32 2147483648, %v409_v16  ;;  %vm415_vm7 = vweird.f32 %v409_v16  ;;  %v419_v23 = vand.u32 2147483647, %v409_v16 }
 0xbe1   :  { %v422_v25 = vor.u32 1.1754944e-38, %v421_v22  ;;  %vm420_vm9 = vcmp.eq.f32.partialorder %v419_v23, 8.507059e+37  ;;  %v590_v22 = vld [vmem:[%s996_s2 + $0x10] sm:$0xff]  ;;  %v589_v23 = vld [vmem:[%s996_s2 + $0x8] sm:$0xff] }
 0xbe5   :  { %v741_v17 = vpop.eup %740 }
 0xbe6   :  { %v411_v18 = vmul.f32 %v741_v17, %v409_v16  ;;  %vm416_vm6 = vweird.f32 %v741_v17 }
 0xbe7   :  { %vm417_vm8 = vmor %vm415_vm7, %vm416_vm6 }
 0xbe8   :  { %v412_v19 = vsub.f32 1.0, %v411_v18 }
 0xbea   :  { %v413_v20 = vmul.f32 %v741_v17, %v412_v19 }
 0xbec   :  { %v414_v21 = vadd.f32 %v741_v17, %v413_v20 }
 0xbee   :  { %v418_v24 = vsel %vm417_vm8, %v741_v17, %v414_v21  ;;  %v591_v21 = vld [vmem:[%s996_s2 + $0x18] sm:$0xff] }
 0xbef   :  { %v423_v27 = vsel %vm420_vm9, %v422_v25, %v418_v24  ;;  %610 = vmatpush.msra.mxu0 %v591_v21  ;;  %v588_v24 = vld [vmem:[%s996_s2] sm:$0xff] }
 0xbf0   :  { %v426_v29 = vmul.f32 %v423_v27, %v371_v5 }
 0xbf1   :  { %611 = vmatpush.msra.mxu0 %v590_v22 }
 0xbf3   :  { %612 = vmatpush.msra.mxu0 %v589_v23 }
 0xbf5   :  { %613 = vmatpush.msra.mxu0 %v588_v24 }
 0xc4d   :  { %v429_v26 = vpop.permute.xlu0 %428 }
 0xc4e   :  { %v431_v28 = vmul.f32 %v429_v26, %v423_v27 }
 0xc50   :  { %433 = vrot.lane.b32.xlu1 %v431_v28, %s867_s11 }
 0xcc2   :  { %v434_v30 = vpop.permute.xlu1 %433 }
 0xcc3   :  { %v436_v31 = vadd.f32 %v434_v30, %v426_v29  ;;  %v695_v29 = vld [vmem:[%s997_s3] ss:$0 sm:$0xff] }
 0xcc5   :  { %742 = vtanh.f32 %v436_v31 }
 0xccb   :  { %v743_v32 = vpop.eup %742 }
 0xccc   :  { %439 = vrot.lane.b32.xlu2 %v743_v32, %s866_s1 }
 0xd26   :  { %v440_v33 = vpop.permute.xlu2 %439 }
 0xd27   :  { %v442_v34 = vmul.f32 %v440_v33, %v423_v27 }
 0xd29   :  { %446 = vrot.lane.b32.xlu0 %v442_v34, %s867_s11 }
 0xd9b   :  { %v447_v35 = vpop.permute.xlu0 %446 }
 0xd9c   :  { %680 = vmatmul.msk.f32.vlgmr.msrb.gmra.mxu2 %vm42_vm0, %v447_v35 }
 0xe1f   :  { %v467_v37 = vpop.f32.mrf.mxu2 }
 0xe20   :  { %v470_v38 = vadd.f32 %v467_v37, %v444_v36 }
 0xe22   :  { %744 = vtanh.f32 %v470_v38  ;;  %v681_v40 = vmul.f32 -1.442695, %v470_v38 }
 0xe24   :  { %746 = vpow2.f32 %v681_v40 }
 0xe28   :  { %v745_v39 = vpop.eup %744 }
 0xe29   :  { %493 = vrot.lane.b32.xlu1 %v745_v39, %s866_s1 }
 0xe2a   :  { %v747_v41 = vpop.eup %746 }
 0xe2b   :  { %v474_v42 = vadd.f32 1.0, %v747_v41 }
 0xe2d   :  { %748 = vrcp.f32 %v474_v42  ;;  %v486_v48 = vand.u32 2147483648, %v474_v42  ;;  %vm480_vm11 = vweird.f32 %v474_v42  ;;  %v484_v49 = vand.u32 2147483647, %v474_v42 }
 0xe2f   :  { %v487_v51 = vor.u32 1.1754944e-38, %v486_v48  ;;  %vm485_vm13 = vcmp.eq.f32.partialorder %v484_v49, 8.507059e+37 }
 0xe33   :  { %v749_v43 = vpop.eup %748 }
 0xe34   :  { %v476_v44 = vmul.f32 %v749_v43, %v474_v42  ;;  %vm481_vm10 = vweird.f32 %v749_v43 }
 0xe35   :  { %vm482_vm12 = vmor %vm480_vm11, %vm481_vm10 }
 0xe36   :  { %v477_v45 = vsub.f32 1.0, %v476_v44 }
 0xe38   :  { %v478_v46 = vmul.f32 %v749_v43, %v477_v45 }
 0xe3a   :  { %v479_v47 = vadd.f32 %v749_v43, %v478_v46 }
 0xe3c   :  { %v483_v50 = vsel %vm482_vm12, %v749_v43, %v479_v47 }
 0xe3d   :  { %v488_v53 = vsel %vm485_vm13, %v487_v51, %v483_v50 }
 0xe3e   :  { %v491_v55 = vmul.f32 %v488_v53, %v436_v31 }
 0xe9b   :  { %v494_v52 = vpop.permute.xlu1 %493 }
 0xe9c   :  { %v496_v54 = vmul.f32 %v494_v52, %v488_v53 }
 0xe9e   :  { %498 = vrot.lane.b32.xlu2 %v496_v54, %s867_s11 }
 0xef8   :  { %v499_v56 = vpop.permute.xlu2 %498 }
 0xef9   :  { %v501_v57 = vadd.f32 %v499_v56, %v491_v55 }
 0xefb   :  { %750 = vtanh.f32 %v501_v57 }
 0xf01   :  { %v751_v58 = vpop.eup %750 }
 0xf02   :  { %504 = vrot.lane.b32.xlu0 %v751_v58, %s866_s1 }
 0xf74   :  { %v505_v59 = vpop.permute.xlu0 %504 }
 0xf75   :  { %v507_v60 = vmul.f32 %v505_v59, %v488_v53 }
 0xf77   :  { %511 = vrot.lane.b32.xlu1 %v507_v60, %s867_s11 }
 0xfe9   :  { %v512_v61 = vpop.permute.xlu1 %511 }
 0xfea   :  { %682 = vmatmul.msk.f32.vlgmr.msrb.gmra.mxu3 %vm42_vm0, %v512_v61 }
0x106d   :  { %v532_v63 = vpop.f32.mrf.mxu3 }
0x106e   :  { %v535_v0 = vadd.f32 %v532_v63, %v509_v62 }
0x1070   :  { %752 = vtanh.f32 %v535_v0  ;;  %v683_v2 = vmul.f32 -1.442695, %v535_v0 }
0x1072   :  { %754 = vpow2.f32 %v683_v2 }
0x1076   :  { %v753_v1 = vpop.eup %752 }
0x1077   :  { %558 = vrot.lane.b32.xlu2 %v753_v1, %s866_s1 }
0x1078   :  { %v755_v3 = vpop.eup %754 }
0x1079   :  { %v539_v4 = vadd.f32 1.0, %v755_v3 }
0x107b   :  { %756 = vrcp.f32 %v539_v4  ;;  %v551_v10 = vand.u32 2147483648, %v539_v4  ;;  %vm545_vm15 = vweird.f32 %v539_v4  ;;  %v549_v11 = vand.u32 2147483647, %v539_v4 }
0x107d   :  { %v552_v13 = vor.u32 1.1754944e-38, %v551_v10  ;;  %vm550_vm2 = vcmp.eq.f32.partialorder %v549_v11, 8.507059e+37 }
0x1081   :  { %v757_v5 = vpop.eup %756 }
0x1082   :  { %v541_v6 = vmul.f32 %v757_v5, %v539_v4  ;;  %vm546_vm14 = vweird.f32 %v757_v5 }
0x1083   :  { %vm547_vm1 = vmor %vm545_vm15, %vm546_vm14 }
0x1084   :  { %v542_v7 = vsub.f32 1.0, %v541_v6 }
0x1086   :  { %v543_v8 = vmul.f32 %v757_v5, %v542_v7 }
0x1088   :  { %v544_v9 = vadd.f32 %v757_v5, %v543_v8 }
0x108a   :  { %v548_v12 = vsel %vm547_vm1, %v757_v5, %v544_v9 }
0x108b   :  { %v553_v15 = vsel %vm550_vm2, %v552_v13, %v548_v12 }
0x108c   :  { %v556_v17 = vmul.f32 %v553_v15, %v501_v57 }
0x10d1   :  { %v559_v14 = vpop.permute.xlu2 %558 }
0x10d2   :  { %v561_v16 = vmul.f32 %v559_v14, %v553_v15 }
0x10d4   :  { %563 = vrot.lane.b32.xlu0 %v561_v16, %s867_s11 }
0x1146   :  { %v564_v18 = vpop.permute.xlu0 %563 }
0x1147   :  { %v566_v19 = vadd.f32 %v564_v18, %v556_v17 }
0x1149   :  { %758 = vtanh.f32 %v566_v19  ;;  %579 = vrot.lane.b32.xlu0 %v566_v19, %s868_s12 }
0x114f   :  { %v759_v20 = vpop.eup %758 }
0x1150   :  { %569 = vrot.lane.b32.xlu1 %v759_v20, %s866_s1 }
0x11bb   :  { %v580_v25 = vpop.permute.xlu0 %579 }
0x11bc   :  { %582 = vst.msk [vmem:[#allocation3] sm:$0xff] %vm42_vm0, %v580_v25 }
0x11bd   :  { %587 = vst.msk [vmem:[#allocation10] sm:$0xff] %vm42_vm0, %v580_v25 }
0x11c2   :  { %v570_v26 = vpop.permute.xlu1 %569 }
0x11c3   :  { %v572_v27 = vmul.f32 %v570_v26, %v553_v15 }
0x11c5   :  { %574 = vrot.lane.b32.xlu2 %v572_v27, %s867_s11 }
0x121f   :  { %v575_v28 = vpop.permute.xlu2 %574 }
0x1220   :  { %577 = vst.msk [vmem:[#allocation2] sm:$0xff] %vm42_vm0, %v575_v28  ;;  %684 = vmatmul.msk.f32.vlgmr.msra.gmra.mxu0 %vm42_vm0, %v575_v28 }
0x1221   :  { %586 = vst.msk [vmem:[#allocation8] sm:$0xff] %vm42_vm0, %v575_v28  ;;  %vm618_vm0 = vcmask 130048  }
0x1222   :  { %641 = dma.vmem_to_hbm [thread:$0]  %s637_s25, 128, %s639_s23, [#allocation9]  }
0x1223   :  { %652 = dma.vmem_to_hbm [thread:$0]  %s648_s29, 128, %s650_s27, [#allocation9]  }
0x129d   :  { %v615_v30 = vpop.f32.mrf.mxu0 }
0x129e   :  { %v616_v31 = vadd.f32 %v695_v29, %v615_v30 }
0x12a0   :  { %619 = vst.msk [vmem:[#allocation7] sm:$0xff] %vm618_vm0, %v616_v31 }
0x12a1   :  { %630 = dma.vmem_to_hbm [thread:$0]  %s626_s7, 128, %s628_s10, [#allocation6]  }
0x12a2   :  { %858 = dma.done.wait [#allocation6], 128  }
0x12a3   :  { %859 = vsyncadd [#allocation6], 4294967168 }
0x12a4   :  { %860 = dma.done.wait [#allocation9], 256  }
0x12a5   :  { %861 = vsyncadd [#allocation9], 4294967040 }
0x12a6   :  { %665 = vsyncpa [#allocation5], 1 }
0x12a7   :  { %666 = vsyncpa [#allocation6], 1 }
0x12a8   :  { %667 = vsyncpa [#allocation9], 1 }

</bundles_post_ra>
